<compile_context>
chip_gen: v6e
topology: v6e:2x2x1
jax: 0.10.0
libtpu: 0.0.40
codegen_flags: <defaults>
</compile_context>

<pallas_src>
import functools
import math

import jax
import jax.numpy as jnp
from jax.experimental import pallas as pl
from jax.experimental.pallas import tpu as pltpu


def _round_up(a, b):
    return ((a + b - 1) // b) * b


def _vmem_limit_bytes():
    """Per-generation scoped-VMEM limit (v7x: 64 MiB/TC vs 128 MiB on v5e/v6e)."""
    cap = 128 * 1024 * 1024
    try:
        cap = int(getattr(pltpu.get_tpu_info(), "vmem_capacity_bytes", cap))
    except Exception:
        pass
    return int(min(max(cap // 2, 32 * 1024 * 1024), 100 * 1024 * 1024))


def _choose_items_per_block(n_items, s, block_rows_target):
    """Items per grid step: 8-sublane aligned, >= 2 grid steps when possible."""
    mult = 8 // math.gcd(s, 8)                 # item granule for 8-row alignment
    ipb = max(1, block_rows_target // s)
    ipb = max(mult, (ipb // mult) * mult)
    # v7x megacore: prefer at least 2 grid steps so both TensorCores get work.
    half = -(-n_items // 2)                    # ceil(N/2)
    half = -(-half // mult) * mult             # rounded up to the granule
    if half < n_items:
        ipb = min(ipb, half)
    if ipb >= n_items:
        return n_items                         # single full block (always legal)
    return ipb


def _cnn_kernel(x_ref, w_ref, o_ref, halo_ref, *, S, W, pad, pad_up):
    """One item-aligned block of flattened rows.

    x_ref:    (BR, D) f32       BR = items_per_block * S, block start item-aligned
    w_ref:    (W*D, Opad)       fused conv taps (matmul dtype), O lane-padded
    o_ref:    (BR, Opad) f32
    halo_ref: (BR + 2*pad_up, D) scratch in matmul dtype
    """
    BR, D = x_ref.shape

    # Stage x into the halo'd scratch (single dtype cast).  x lands at a
    # sublane-aligned offset (pad_up = 8), so the big store is unmasked.
    halo_ref[pl.ds(pad_up, BR), :] = x_ref[...].astype(halo_ref.dtype)
    if pad > 0:
        # Zero the halo bands.  (Block boundaries are item boundaries, so the
        # same-item mask below also covers them; zeroing keeps reads defined.)
        halo_ref[0:pad_up, :] = jnp.zeros((pad_up, D), halo_ref.dtype)
        halo_ref[pl.ds(pad_up + BR, pad_up), :] = jnp.zeros((pad_up, D), halo_ref.dtype)

    # Row position within its item (block start is a multiple of S).
    s_idx = jax.lax.broadcasted_iota(jnp.int32, (BR, 1), 0) % S

    zero = jnp.zeros((), halo_ref.dtype)
    taps = []
    for w in range(W):                         # W small & static -> unrolled
        dw = w - pad                           # row offset of this conv tap
        # Static-offset slice of the halo'd scratch (no roll, no VMEM copies).
        xs = halo_ref[pl.ds(pad_up + dw, BR), :]
        if dw < 0:                             # Conv2d zero padding / item edges
            xs = jnp.where(s_idx >= -dw, xs, zero)
        elif dw > 0:
            xs = jnp.where(s_idx < S - dw, xs, zero)
        taps.append(xs)

    # Single fused MXU call with K = W*D (instead of W separate K=D matmuls
    # plus (W-1) full (BR, Opad) accumulator adds).
    xs_cat = taps[0] if W == 1 else jnp.concatenate(taps, axis=-1)  # (BR, W*D)
    acc = jnp.dot(xs_cat, w_ref[...], preferred_element_type=jnp.float32)
    o_ref[...] = jnp.tanh(acc).astype(o_ref.dtype)


def cnn_forward(x, x_mask, weight_torch_layout, window_size, *,
                block_rows_target=8192, matmul_dtype=jnp.bfloat16):
    """x: (N, S, D) float32; weight_torch_layout: (O, 1, W, D); x_mask unused."""
    del x_mask  # kept for API parity with the RNN interface; unused (as in torch)
    if window_size % 2 != 1:
        raise ValueError("window size must be an odd number")

    N, S, D = x.shape
    O = weight_torch_layout.shape[0]
    W = window_size
    pad = (W - 1) // 2
    if pad > 8:
        raise ValueError("window sizes > 17 not supported by this kernel")
    pad_up = 8  # sublane-aligned halo depth (>= pad)

    # torch (O, 1, W, D) -> (W, D, O); lane-pad O to a multiple of 128 so
    # every output store is unmasked/lane-dense, then fuse taps along K:
    # (W, D, Opad) -> (W*D, Opad).  (For pathological O just above a multiple
    # of 128 this inflates writeback; lane density wins for typical O.)
    w_wdo = jnp.transpose(weight_torch_layout[:, 0, :, :], (1, 2, 0))
    Opad = _round_up(O, 128)
    if Opad != O:
        w_wdo = jnp.pad(w_wdo, ((0, 0), (0, 0), (0, Opad - O)))
    w2d = w_wdo.reshape(W * D, Opad).astype(matmul_dtype)

    # Flatten items into the MXU M dimension (free, row-major).
    total_rows = N * S
    x2d = x.reshape(total_rows, D).astype(jnp.float32)

    # Per-generation VMEM budget and a row cap so the (double-buffered) blocks
    # fit comfortably (v7x has half the VMEM of v5e/v6e).
    vmem_limit = _vmem_limit_bytes()
    mm_itemsize = jnp.dtype(matmul_dtype).itemsize
    bytes_per_row = (2 * Opad * 4              # out block, double-buffered, f32
                     + Opad * 4                # f32 accumulator / tanh temp
                     + 2 * D * 4               # in block, double-buffered, f32
                     + D * mm_itemsize         # halo scratch
                     + W * D * mm_itemsize)    # fused-K shifted views
    rows_cap = max(8, int(vmem_limit * 0.6) // bytes_per_row)
    eff_target = max(8, min(block_rows_target, rows_cap))

    items_per_block = _choose_items_per_block(N, S, eff_target)
    block_rows = items_per_block * S           # item-aligned; multiple of 8 or full
    grid = (pl.cdiv(total_rows, block_rows),)

    kernel = functools.partial(_cnn_kernel, S=S, W=W, pad=pad, pad_up=pad_up)

    out2d = pl.pallas_call(
        kernel,
        out_shape=jax.ShapeDtypeStruct((total_rows, Opad), jnp.float32),
        grid_spec=pltpu.PrefetchScalarGridSpec(
            num_scalar_prefetch=0,
            grid=grid,
            in_specs=[
                pl.BlockSpec((block_rows, D), lambda i: (i, 0)),
                pl.BlockSpec((W * D, Opad), lambda i: (0, 0)),   # resident weight
            ],
            out_specs=pl.BlockSpec((block_rows, Opad), lambda i: (i, 0)),
            scratch_shapes=[
                pltpu.VMEM((block_rows + 2 * pad_up, D), matmul_dtype),
            ],
        ),
        compiler_params=pltpu.CompilerParams(
            dimension_semantics=("parallel",),   # shard blocks across TCs (v7x)
            vmem_limit_bytes=vmem_limit,
        ),
    )(x2d, w2d)

    out = out2d.reshape(N, S, Opad)
    if Opad != O:
        out = out[:, :, :O]
    return out


def _reference(x, weight_torch_layout, window_size):
    """Pure-JAX reference mirroring the PyTorch forward (eval mode)."""
    N, S, D = x.shape
    W = window_size
    pad = (W - 1) // 2
    w = jnp.transpose(weight_torch_layout[:, 0, :, :], (1, 2, 0))  # (W, D, O)
    x_pad = jnp.pad(x, ((0, 0), (pad, pad), (0, 0)))
    acc = jnp.zeros((N, S, weight_torch_layout.shape[0]), jnp.float32)
    for t in range(W):
        acc = acc + jnp.einsum("nsd,do->nso", x_pad[:, t:t + S, :], w[t])
    return jnp.tanh(acc)


if __name__ == "__main__":
    # Small shapes consistent with the module's forward.
    num_items = 16          # N
    max_subitem_size = 8    # S
    input_size = 16         # D
    window_size = 3         # W (must be odd)
    output_size = 128       # O

    key = jax.random.PRNGKey(0)
    kx, kw = jax.random.split(key)

    x = jax.random.normal(kx, (num_items, max_subitem_size, input_size), jnp.float32)
    x_mask = jnp.zeros((num_items, max_subitem_size), jnp.float32)  # unused

    # Deterministic xavier_uniform init for Conv2d weight (O, 1, W, D), bias=False.
    fan_in = 1 * window_size * input_size
    fan_out = output_size * window_size * input_size
    bound = (6.0 / (fan_in + fan_out)) ** 0.5
    weight = jax.random.uniform(
        kw, (output_size, 1, window_size, input_size),
        minval=-bound, maxval=bound, dtype=jnp.float32)

    ref = _reference(x, weight, window_size)

    # Default path: bf16 MXU inputs, f32 accumulate/tanh/output; the grid is
    # split into 2 blocks (v7x both-TC path) even at this small N.
    out = cnn_forward(x, x_mask, weight, window_size)
    out = jax.block_until_ready(out)
    assert out.shape == (num_items, max_subitem_size, output_size)
    assert jnp.allclose(out, ref, atol=2e-2, rtol=0.0), \
        float(jnp.max(jnp.abs(out - ref)))

    # f32 path with a tiny, non-dividing block target: exercises multi-block
    # tiling + the partial final block, and checks tight numerics.
    out_f32 = cnn_forward(x, x_mask, weight, window_size,
                          block_rows_target=40, matmul_dtype=jnp.float32)
    out_f32 = jax.block_until_ready(out_f32)
    assert jnp.allclose(out_f32, ref, atol=1e-4, rtol=1e-4), \
        float(jnp.max(jnp.abs(out_f32 - ref)))

    print("KERNEL_OK")
</pallas_src>

<mosaic_0001>
module attributes {stable_mosaic.version = 11 : i64} {
  func.func @_cnn_kernel(%arg0: i32, %arg1: memref<64x16xf32, #tpu.memory_space<vmem>>, %arg2: memref<48x128xbf16, #tpu.memory_space<vmem>>, %arg3: memref<64x128xf32, #tpu.memory_space<vmem>>, %arg4: memref<80x16xbf16, #tpu.memory_space<vmem>>) attributes {dimension_semantics = [#tpu.dimension_semantics<parallel>], iteration_bounds = array<i64: 2>, scalar_prefetch = 0 : i64, scratch_operands = 1 : i64, tpu.core_type = #tpu.core_type<tc>, window_params = [{transform_indices = @transform_0, window_bounds = array<i64: 64, 16>}, {pipeline_mode = #tpu.pipeline_mode<synchronous>, transform_indices = @transform_1, window_bounds = array<i64: 48, 128>}, {transform_indices = @transform_2, window_bounds = array<i64: 64, 128>}]} {
    %c0 = arith.constant 0 : index
    %c0_0 = arith.constant 0 : index
    %0 = vector.load %arg1[%c0, %c0_0] : memref<64x16xf32, #tpu.memory_space<vmem>>, vector<64x16xf32>
    %1 = arith.truncf %0 : vector<64x16xf32> to vector<64x16xbf16>
    %c8 = arith.constant 8 : index
    %c0_1 = arith.constant 0 : index
    %2 = vector.load %arg4[%c8, %c0_1] : memref<80x16xbf16, #tpu.memory_space<vmem>>, vector<64x16xbf16>
    tpu.vector_store %arg4[%c8, %c0_1], %1 {strides = array<i32>} : memref<80x16xbf16, #tpu.memory_space<vmem>>, vector<64x16xbf16>,
    %cst = arith.constant 0.000000e+00 : bf16
    %3 = vector.broadcast %cst : bf16 to vector<8x16xbf16>
    %c0_2 = arith.constant 0 : index
    %c0_3 = arith.constant 0 : index
    %4 = vector.load %arg4[%c0_2, %c0_3] : memref<80x16xbf16, #tpu.memory_space<vmem>>, vector<8x16xbf16>
    tpu.vector_store %arg4[%c0_2, %c0_3], %3 {strides = array<i32>} : memref<80x16xbf16, #tpu.memory_space<vmem>>, vector<8x16xbf16>,
    %cst_4 = arith.constant 0.000000e+00 : bf16
    %5 = vector.broadcast %cst_4 : bf16 to vector<8x16xbf16>
    %c72 = arith.constant 72 : index
    %c0_5 = arith.constant 0 : index
    %6 = vector.load %arg4[%c72, %c0_5] : memref<80x16xbf16, #tpu.memory_space<vmem>>, vector<8x16xbf16>
    tpu.vector_store %arg4[%c72, %c0_5], %5 {strides = array<i32>} : memref<80x16xbf16, #tpu.memory_space<vmem>>, vector<8x16xbf16>,
    %7 = tpu.iota {dimensions = array<i32: 0>} : vector<64x1xi32>
    %c8_i32 = arith.constant 8 : i32
    %c0_i32 = arith.constant 0 : i32
    %8 = arith.cmpi eq, %c8_i32, %c0_i32 : i32
    %c1_i32 = arith.constant 1 : i32
    %9 = arith.select %8, %c1_i32, %c8_i32 : i32
    %10 = vector.broadcast %9 : i32 to vector<64x1xi32>
    %11 = arith.remsi %7, %10 : vector<64x1xi32>
    %c0_i32_6 = arith.constant 0 : i32
    %12 = vector.broadcast %c0_i32_6 : i32 to vector<64x1xi32>
    %13 = arith.cmpi ne, %11, %12 : vector<64x1xi32>
    %c0_i32_7 = arith.constant 0 : i32
    %14 = vector.broadcast %c0_i32_7 : i32 to vector<64x1xi32>
    %15 = arith.cmpi slt, %11, %14 : vector<64x1xi32>
    %c0_i32_8 = arith.constant 0 : i32
    %16 = arith.cmpi slt, %9, %c0_i32_8 : i32
    %17 = vector.broadcast %16 : i1 to vector<64x1xi1>
    %18 = vector.broadcast %17 : vector<64x1xi1> to vector<64x1xi1>
    %19 = arith.xori %15, %18 : vector<64x1xi1>
    %20 = arith.andi %19, %13 : vector<64x1xi1>
    %21 = vector.broadcast %9 : i32 to vector<64x1xi32>
    %22 = arith.addi %11, %21 : vector<64x1xi32>
    %23 = arith.select %20, %22, %11 : vector<64x1xi1>, vector<64x1xi32>
    %c7 = arith.constant 7 : index
    %c0_9 = arith.constant 0 : index
    %24 = vector.load %arg4[%c7, %c0_9] : memref<80x16xbf16, #tpu.memory_space<vmem>>, vector<64x16xbf16>
    %c1_i32_10 = arith.constant 1 : i32
    %25 = vector.broadcast %c1_i32_10 : i32 to vector<64x1xi32>
    %26 = arith.cmpi sge, %23, %25 : vector<64x1xi32>
    %cst_11 = arith.constant 0.000000e+00 : bf16
    %27 = vector.shape_cast %26 : vector<64x1xi1> to vector<64x1xi1>
    %28 = vector.broadcast %27 : vector<64x1xi1> to vector<64x16xi1>
    %29 = vector.broadcast %cst_11 : bf16 to vector<64x16xbf16>
    %30 = arith.select %28, %24, %29 : vector<64x16xi1>, vector<64x16xbf16>
    %c8_12 = arith.constant 8 : index
    %c0_13 = arith.constant 0 : index
    %31 = vector.load %arg4[%c8_12, %c0_13] : memref<80x16xbf16, #tpu.memory_space<vmem>>, vector<64x16xbf16>
    %c9 = arith.constant 9 : index
    %c0_14 = arith.constant 0 : index
    %32 = vector.load %arg4[%c9, %c0_14] : memref<80x16xbf16, #tpu.memory_space<vmem>>, vector<64x16xbf16>
    %c7_i32 = arith.constant 7 : i32
    %33 = vector.broadcast %c7_i32 : i32 to vector<64x1xi32>
    %34 = arith.cmpi slt, %23, %33 : vector<64x1xi32>
    %cst_15 = arith.constant 0.000000e+00 : bf16
    %35 = vector.shape_cast %34 : vector<64x1xi1> to vector<64x1xi1>
    %36 = vector.broadcast %35 : vector<64x1xi1> to vector<64x16xi1>
    %37 = vector.broadcast %cst_15 : bf16 to vector<64x16xbf16>
    %38 = arith.select %36, %32, %37 : vector<64x16xi1>, vector<64x16xbf16>
    %39 = tpu.concatenate %30, %31, %38 in 1 : vector<64x16xbf16>, vector<64x16xbf16>, vector<64x16xbf16> -> vector<64x48xbf16>
    %c0_16 = arith.constant 0 : index
    %c0_17 = arith.constant 0 : index
    %40 = vector.load %arg2[%c0_16, %c0_17] : memref<48x128xbf16, #tpu.memory_space<vmem>>, vector<48x128xbf16>
    %cst_18 = arith.constant dense<0.000000e+00> : vector<64x128xf32>
    %41 = tpu.matmul %39, %40, %cst_18 {dimension_numbers = #tpu.dot_dimension_numbers<[1], [0], [0], [1], [0, 0, 1, 1], [], []>} : vector<64x48xbf16>, vector<48x128xbf16>, vector<64x128xf32> -> vector<64x128xf32>
    %42 = math.tanh %41 : vector<64x128xf32>
    %c0_19 = arith.constant 0 : index
    %c0_20 = arith.constant 0 : index
    %43 = vector.load %arg3[%c0_19, %c0_20] : memref<64x128xf32, #tpu.memory_space<vmem>>, vector<64x128xf32>
    tpu.vector_store %arg3[%c0_19, %c0_20], %42 {strides = array<i32>} : memref<64x128xf32, #tpu.memory_space<vmem>>, vector<64x128xf32>,
    return
  }
  func.func @transform_0(%arg0: i32) -> (i32, i32) {
    %c0_i32 = arith.constant 0 : i32
    %c0_i32_0 = arith.constant 0 : i32
    return %arg0, %c0_i32 : i32, i32
  }
  func.func @transform_1(%arg0: i32) -> (i32, i32) {
    %c0_i32 = arith.constant 0 : i32
    %c0_i32_0 = arith.constant 0 : i32
    %c0_i32_1 = arith.constant 0 : i32
    return %c0_i32, %c0_i32_0 : i32, i32
  }
  func.func @transform_2(%arg0: i32) -> (i32, i32) {
    %c0_i32 = arith.constant 0 : i32
    %c0_i32_0 = arith.constant 0 : i32
    return %arg0, %c0_i32 : i32, i32
  }
}

</mosaic_0001>

<bundles_post_ra>
// kernel: tpu_custom_call.1
= control target key start
LH: loop header
LB: loop body
LE: loop exit
PB: predicated region body
PF: predicated region fallthrough
CT: control target
= control target key end

     0   :  { %7 = vsyncpa [#allocation4], 0  ;;  %s1633_s0 = inlined_call_operand.vmem [shape: f32[128,16], index: 0, kind: input, shape index: {}]   ;;  %s1634_s1 = inlined_call_operand.vmem [shape: bf16[48,128], index: 1, kind: input, shape index: {}]   ;;  %s1635_s2 = inlined_call_operand.hbm [shape: f32[128,128], index: 2, kind: output, shape index: {}]  }
   0x1   :  { %9 = vsyncpa [#allocation4 + $0x1], 0  ;;  %s1204_s9 = smov 0   ;;  %s1206_s10 = smov 0  }
   0x2   :  { %s1208_s11 = smov 0   ;;  %s1210_s12 = smov 0  }
   0x3 LB: > { %s1225_s13 = sadd.s32 4294967295, %s1181_s12   ;;  %s978_s14 = sadd.s32 4294967294, %s1181_s12   ;;  %s1181_s12 = sphi %s1210_s12, %s1665_s12   ;;  %s1177_s11 = sphi %s1208_s11, %s1664_s11   ;;  %s1173_s10 = sphi %s1206_s10, %s1663_s10   ;;  %s1169_s9 = sphi %s1204_s9, %s1662_s9  }
   0x4   : > { %s1229_s15 = sadd.s32 1, %s1181_s12   ;;  %s69_s16 = sadd.s32 1, %s1177_s11 }
   0x5   : > { %s66_s17 = ssub.s32 %s1181_s12, %s1229_s15  ;;  %p79_p0 = scmp.ne.s32.totalorder %s1177_s11, %s1173_s10 }
   0x6   : > { %p67_p1 = scmp.eq.s32.totalorder %s66_s17, 0  ;;  %p80_p2 = scmp.eq.s32.totalorder %s1225_s13, 1 }
   0x7   : > { %p85_p3 = scmp.ne.s32.totalorder %s1173_s10, %s1169_s9  ;;  %p86_p4 = scmp.eq.s32.totalorder %s978_s14, 1 }
   0x8   : > { %s1240_s18 = scalar_select %p67_p1, %s1177_s11, %s69_s16  }
   0x9   : > { %p1242_p5 = por %p80_p2, %p79_p0  ;;  %p1246_p6 = por %p86_p4, %p85_p3 }
   0xa   : > { %p981_p7 = scmp.ge.s32.totalorder %s1181_s12, 1  ;;  %p116_p8 = scmp.lt.s32.totalorder %s1181_s12, 3 }
   0xc   : > { %p117_p9 = pnand %p981_p7, %p116_p8 }
   0xd   : > { %s983_s21 = sshll.u32 (!%p117_p9), %s1225_s13, 3  ;;  %s1184_s26 = smov (!%p117_p9), 32  }
   0xe   : > { %120 = sbr.rel (%p117_p9) target bundleno = 418 (0x1a2), region = 28  ;;  %p139_p10 = scmp.lt.s32.totalorder (!%p117_p9), %s983_s21, 15 }
   0xf   : > { %s1185_s3 = smov (!%p117_p9), 16   ;;  %s135_s6 = sand.u32 (!%p117_p9), 1, %s1173_s10  }
  0x10   : > { %s982_s7 = sshll.u32 (!%p117_p9), %s135_s6, 6  ;;  %s1027_s14 = sshll.u32 (!%p117_p9), %s1225_s13, 10 }
  0x11   : > { %s137_s8 = scalar_lea.vmem (!%p117_p9), [#allocation3], %s982_s7  ;;  %s1593_s13 = scalar_lea.sflag (!%p117_p9), [#allocation4], %s135_s6 }
  0x12   : > { %s916_s16 = sshll.u32 (!%p117_p9), %s137_s8, 4  ;;  %s1186_s24 = smov (!%p117_p9), [#allocation3]   ;;  %s1589_s16 = int_to_ptr.vmem [resolvable:$true] %s916_s16 }
  0x13   : > { %vm188_vm0 = vcmask 125952   ;;  %v199_v0 = vlaneseq  ;;  %v1183_v1 = vmov 0   ;;  %vm494_vm1 = vsmask.f32 256  ;;  %s1667_s21 = smov (!%p139_p10, %s983_s21), 15  ;;  %s1121_s23 = scalar_lea.vmem %s1589_s16, 1024 }
  0x14   : > { %197 = vst.msk [vmem:[#allocation2] sm:$0xf] %vm188_vm0, %v1183_v1  ;;  %198 = vst.msk [vmem:[#allocation2 + $0x24] sm:$0xf] %vm188_vm0, %v1183_v1  ;;  %s984_s22 = sshll.u32 %s1667_s21, 3  ;;  %p1122_p11 = scmp.ne.s32.totalorder %s1589_s16, %s1121_s23 }
  0x15   : > { %v1257_v2 = vshrl.u32 %v199_v0, 7  ;;  %vm495_vm2 = vsmask.f32 4368  ;;  %s1281_s25 = scalar_lea.vmem %s1633_s0, %s984_s22  ;;  %s1587_s22 = scalar_lea.hbm %s1635_s2, %s1027_s14 }
  0x16   : > { %v148_v13 = vld [vmem:[%s1281_s25] sm:$0xff]  ;;  %v149_v14 = vld [vmem:[%s1281_s25 + $0x8] sm:$0xff]  ;;  %v150_v22 = vld [vmem:[%s1281_s25 + $0x10] sm:$0xff]  ;;  %p1123_p12 = pnand %p1122_p11, %p1242_p5 }
  0x17   : > { %v1260_v3 = vadd.s32 8, %v1257_v2  ;;  %v212_v4 = vand.u32 7, %v1257_v2  ;;  %v1264_v5 = vadd.s32 16, %v1257_v2  ;;  %v1267_v6 = vadd.s32 24, %v1257_v2  ;;  %v151_v23 = vld [vmem:[%s1281_s25 + $0x18] sm:$0xff]  ;;  %v152_v24 = vld [vmem:[%s1281_s25 + $0x20] sm:$0xff]  ;;  %vm1309_vm7 = vmor %vm494_vm1, %vm495_vm2 }
  0x18   : > { %v1270_v7 = vadd.s32 32, %v1257_v2  ;;  %v1273_v8 = vadd.s32 40, %v1257_v2  ;;  %v1276_v9 = vadd.s32 48, %v1257_v2  ;;  %v1288_v12 = vadd.s32 56, %v1257_v2  ;;  %v153_v29 = vld [vmem:[%s1281_s25 + $0x28] sm:$0xff]  ;;  %v154_v30 = vld [vmem:[%s1281_s25 + $0x30] sm:$0xff]  ;;  %p1124_p13 = pneg %p1123_p12 }
  0x19   : > { %v219_v10 = vand.u32 7, %v1260_v3  ;;  %vm454_vm3 = vcmp.lt.s32.totalorder %v212_v4, 7  ;;  %v226_v11 = vand.u32 7, %v1264_v5  ;;  %v233_v15 = vand.u32 7, %v1267_v6  ;;  %v155_v51 = vld [vmem:[%s1281_s25 + $0x38] sm:$0xff]  ;;  %s1125_s25 = sshll.u32 %s1186_s24, 4  ;;  %s1126_s25 = int_to_ptr.vmem [resolvable:$false] %s1125_s25 }
  0x1a   : > { %vm478_vm4 = vmpackc.low %vm454_vm3, %vm454_vm3  ;;  %v240_v16 = vand.u32 7, %v1270_v7  ;;  %v247_v17 = vand.u32 7, %v1273_v8  ;;  %v254_v18 = vand.u32 7, %v1276_v9  ;;  %v1019_v19 = vpack.c.bf16 %v148_v13, %v148_v13  ;;  %p1128_p0 = scmp.lt.s32.totalorder %s1589_s16, %s1126_s25 }
  0x1b   : > { %v1020_v20 = vpack.c.bf16 %v149_v14, %v149_v14  ;;  %vm455_vm5 = vcmp.lt.s32.totalorder %v219_v10, 7  ;;  %v486_v21 = vsel %vm478_vm4, 65537, %v1183_v1  ;;  %v1021_v27 = vpack.c.bf16 %v150_v22, %v150_v22 }
  0x1c   : > { %vm479_vm6 = vmpackc.low %vm455_vm5, %vm455_vm5  ;;  %v498_v25 = vshrl.u32 %v486_v21, 16  ;;  %v501_v26 = vshll.u32 %v486_v21, 16  ;;  %v1022_v28 = vpack.c.bf16 %v151_v23, %v151_v23  ;;  %189 = vst.msk [vmem:[#allocation2 + $0x4] sm:$0xf] %vm188_vm0, %v1019_v19  ;;  %vm456_vm8 = vcmp.lt.s32.totalorder %v226_v11, 7 }
  0x1d   : > { %190 = vst.msk [vmem:[#allocation2 + $0x8] sm:$0xf] %vm188_vm0, %v1020_v20  ;;  %v487_v31 = vsel %vm479_vm6, 65537, %v1183_v1  ;;  %vm1317_vm9 = vcmp.lt.s32.totalorder %v233_v15, 7  ;;  %v1023_v34 = vpack.c.bf16 %v152_v24, %v152_v24  ;;  %191 = vst.msk [vmem:[#allocation2 + $0xc] sm:$0xf] %vm188_vm0, %v1021_v27  ;;  %v1024_v38 = vpack.c.bf16 %v153_v29, %v153_v29 }
  0x1e   : > { %v500_v35 = vrot.slane %v498_v25, 7  ;;  %v506_v36 = vshrl.u32 %v487_v31, 16  ;;  %v509_v37 = vshll.u32 %v487_v31, 16  ;;  %192 = vst.msk [vmem:[#allocation2 + $0x10] sm:$0xf] %vm188_vm0, %v1022_v28  ;;  %vm480_vm10 = vmpackc.low %vm456_vm8, %vm456_vm8  ;;  %vm1330_vm12 = vcmp.lt.s32.totalorder %v240_v16, 7 }
  0x1f   : > { %vm481_vm11 = vmpackc.low %vm1317_vm9, %vm1317_vm9  ;;  %v488_v39 = vsel %vm480_vm10, 65537, %v1183_v1  ;;  %193 = vst.msk [vmem:[#allocation2 + $0x14] sm:$0xf] %vm188_vm0, %v1023_v34  ;;  %vm1336_vm13 = vcmp.lt.s32.totalorder %v247_v17, 7  ;;  %v1025_v42 = vpack.c.bf16 %v154_v30, %v154_v30  ;;  %vm697_vm2 = vcmask 1042432  }
  0x20   : > { %v503_v43 = vor.u32 %v501_v26, %v500_v35  ;;  %v504_v44 = vrot.slane %v500_v35, 4  ;;  %v508_v45 = vrot.slane %v506_v36, 7  ;;  %v489_v46 = vsel %vm481_vm11, 65537, %v1183_v1  ;;  %194 = vst.msk [vmem:[#allocation2 + $0x18] sm:$0xf] %vm188_vm0, %v1024_v38  ;;  %vm482_vm14 = vmpackc.low %vm1330_vm12, %vm1330_vm12 }
  0x21   : > { %v515_v47 = vshrl.u32 %v488_v39, 16  ;;  %v518_v48 = vshll.u32 %v488_v39, 16  ;;  %v524_v49 = vshrl.u32 %v489_v46, 16  ;;  %v527_v50 = vshll.u32 %v489_v46, 16  ;;  %vm483_vm15 = vmpackc.low %vm1336_vm13, %vm1336_vm13  ;;  %195 = vst.msk [vmem:[#allocation2 + $0x1c] sm:$0xf] %vm188_vm0, %v1025_v42 }
  0x22   : > { %v511_v52 = vor.u32 %v509_v37, %v508_v45  ;;  %vm568_vm1 = vcmp.ne.s16.totalorder %v503_v43, 0  ;;  %v513_v53 = vrot.slane %v508_v45, 4  ;;  %v490_v54 = vsel %vm482_vm14, 65537, %v1183_v1 }
  0x23   : > { %v517_v55 = vrot.slane %v515_v47, 7  ;;  %v526_v56 = vrot.slane %v524_v49, 7  ;;  %v491_v57 = vsel %vm483_vm15, 65537, %v1183_v1  ;;  %v533_v58 = vshrl.u32 %v490_v54, 16  ;;  %v1352_v59 = vld [vmem:[#allocation2 + $0x4] sm:$0xf] }
  0x24   : > { %v1354_v60 = vld [vmem:[#allocation2 + $0x8] sm:$0xf]  ;;  %v512_v61 = vsel %vm1309_vm7, %v504_v44, %v511_v52  ;;  %v536_v62 = vshll.u32 %v490_v54, 16  ;;  %v542_v63 = vshrl.u32 %v491_v57, 16  ;;  %v1026_v0 = vpack.c.bf16 %v155_v51, %v155_v51  ;;  %v1368_v22 = vld [vmem:[#allocation2 + $0xc] sm:$0xf] }
  0x25   : > { %vm569_vm3 = vcmp.ne.s16.totalorder %v512_v61, 0  ;;  %v577_v13 = vsel %vm568_vm1, %v1352_v59, 0  ;;  %v998_v14 = vcombine.low %v1352_v59, %v1354_v60  ;;  %v520_v19 = vor.u32 %v518_v48, %v517_v55  ;;  %v1371_v27 = vld [vmem:[#allocation2 + $0x10] sm:$0xf] }
  0x26   : > { %vm1363_vm4 = vcmp.ge.s32.totalorder %v212_v4, 1  ;;  %v578_v21 = vsel %vm569_vm3, %v1354_v60, 0  ;;  %v522_v23 = vrot.slane %v517_v55, 4  ;;  %v529_v24 = vor.u32 %v527_v50, %v526_v56  ;;  %196 = vst.msk [vmem:[#allocation2 + $0x20] sm:$0xf] %vm188_vm0, %v1026_v0  ;;  %v1102_v0 = vld [vmem:[%s1634_s1 + $0x10] sm:$0xff]  }
  0x27   : > { %v531_v25 = vrot.slane %v526_v56, 4  ;;  %v1002_v26 = vcombine.low %v577_v13, %v578_v21  ;;  %v521_v28 = vsel %vm1309_vm7, %v513_v53, %v520_v19  ;;  %v535_v2 = vrot.slane %v533_v58, 7  ;;  %v1379_v30 = vld [vmem:[#allocation2 + $0x14] sm:$0xf]  ;;  %v1382_v36 = vld [vmem:[#allocation2 + $0x18] sm:$0xf]  ;;  %vm337_vm11 = vmpackc.low %vm1363_vm4, %vm1363_vm4  ;;  %1035 = vmatprep.subr.bf16.mxu0 %v1102_v0  ;;  %1049 = vmatprep.subr.bf16.mxu1 %v1102_v0 }
  0x28   : > { %v1375_v4 = vrot.slane %v542_v63, 7  ;;  %v530_v29 = vsel %vm1309_vm7, %v522_v23, %v529_v24  ;;  %vm570_vm5 = vcmp.ne.s16.totalorder %v521_v28, 0  ;;  %v545_v31 = vshll.u32 %v491_v57, 16  ;;  %v1395_v48 = vld [vmem:[#allocation2 + $0x1c] sm:$0xf]  ;;  %1036 = vmatpush3.bf16.msra.mxu0 %v1102_v0  ;;  %1052 = vmatpush3.bf16.msra.mxu1 %v1102_v0 }
  0x29   : > { %v630_v33 = vshrl.u32 %v998_v14, 16  ;;  %v698_v34 = vrot.slane %v1002_v26, 5  ;;  %vm571_vm6 = vcmp.ne.s16.totalorder %v530_v29, 0  ;;  %v579_v35 = vsel %vm570_vm5, %v1368_v22, 0 }
  0x2a   : > { %v538_v37 = vor.u32 %v536_v62, %v535_v2  ;;  %v580_v38 = vsel %vm571_vm6, %v1371_v27, 0  ;;  %v540_v39 = vrot.slane %v535_v2, 4  ;;  %v547_v40 = vor.u32 %v545_v31, %v1375_v4 }
  0x2b   : > { %v632_v41 = vrot.slane %v630_v33, 4  ;;  %707 = vrot.lane.b32.xlu1 %v698_v34, %s1184_s26  ;;  %v1003_v42 = vcombine.low %v579_v35, %v580_v38  ;;  %v633_v44 = vshll.u32 %v998_v14, 16  ;;  %v999_v45 = vcombine.low %v1368_v22, %v1371_v27 }
  0x2c   : > { %v539_v43 = vsel %vm1309_vm7, %v531_v25, %v538_v37  ;;  %v548_v46 = vsel %vm1309_vm7, %v540_v39, %v547_v40  ;;  %v1000_v47 = vcombine.low %v1379_v30, %v1382_v36  ;;  %v261_v49 = vand.u32 7, %v1288_v12  ;;  %v1103_v37 = vld [vmem:[%s1634_s1 + $0x8] sm:$0xff]   ;;  %v304_v25 = vld [vmem:[#allocation2] sm:$0x8] }
  0x2d   : > { %vm572_vm0 = vcmp.ne.s16.totalorder %v539_v43, 0  ;;  %v699_v50 = vrot.slane %v1003_v42, 5  ;;  %vm573_vm8 = vcmp.ne.s16.totalorder %v548_v46, 0  ;;  %v635_v52 = vrot.slane %v633_v44, 5  ;;  %v1399_v53 = vld [vmem:[#allocation2 + $0x20] sm:$0xf]  ;;  %1037 = vmatprep.subr.bf16.mxu0 %v1103_v37  ;;  %1050 = vmatprep.subr.bf16.mxu1 %v1103_v37 }
  0x2e   : > { %v581_v51 = vsel %vm572_vm0, %v1379_v30, 0  ;;  %v582_v54 = vsel %vm573_vm8, %v1382_v36, 0  ;;  %v638_v55 = vshrl.u32 %v999_v45, 16  ;;  %v641_v56 = vshll.u32 %v999_v45, 16  ;;  %1038 = vmatpush3.bf16.msra.mxu0 %v1103_v37  ;;  %1053 = vmatpush3.bf16.msra.mxu1 %v1103_v37 }
  0x2f   : > { %v647_v57 = vshrl.u32 %v1000_v47, 16  ;;  %v700_v58 = vsel %vm697_vm2, %v698_v34, %v699_v50  ;;  %v1004_v61 = vcombine.low %v581_v51, %v582_v54  ;;  %v636_v62 = vor.u32 %v635_v52, %v632_v41  ;;  %v1104_v54 = vld [vmem:[%s1634_s1] sm:$0xff]  }
  0x30   : > { %v650_v63 = vshll.u32 %v1000_v47, 16  ;;  %709 = vrot.lane.b32.xlu0 %v700_v58, %s1184_s26  ;;  %v640_v13 = vrot.slane %v638_v55, 4  ;;  %v643_v14 = vrot.slane %v641_v56, 5  ;;  %v1001_v21 = vcombine.low %v1395_v48, %v1399_v53  ;;  %1039 = vmatprep.subr.bf16.mxu0 %v1104_v54 }
  0x31   : > { %v649_v19 = vrot.slane %v647_v57, 4  ;;  %v1409_v23 = vrot.slane %v1004_v61, 5  ;;  %vm1413_vm9 = vcmp.lt.s32.totalorder %v254_v18, 7  ;;  %vm1419_vm10 = vcmp.lt.s32.totalorder %v261_v49, 7  ;;  %v453_v57 = vld [vmem:[#allocation2 + $0x24] sm:$0x1]  ;;  %1051 = vmatprep.subr.bf16.mxu1 %v1104_v54 }
  0x32   : > { %v652_v24 = vrot.slane %v650_v63, 5  ;;  %vm353_vm12 = vsmask.f32 3328  ;;  %v644_v28 = vor.u32 %v643_v14, %v640_v13  ;;  %v656_v2 = vshrl.u32 %v1001_v21, 16  ;;  %vm484_vm13 = vmpackc.low %vm1413_vm9, %vm1413_vm9  ;;  %1040 = vmatpush3.bf16.msra.mxu0 %v1104_v54  ;;  %1054 = vmatpush3.bf16.msra.mxu1 %v1104_v54 }
  0x33   : > { %v659_v29 = vshll.u32 %v1001_v21, 16  ;;  %v702_v31 = vsel %vm697_vm2, %v699_v50, %v1409_v23  ;;  %vm485_vm14 = vmpackc.low %vm1419_vm10, %vm1419_vm10  ;;  %v492_v34 = vsel %vm484_vm13, 65537, %v1183_v1  ;;  %vm1437_vm15 = vcmp.ge.s32.totalorder %v219_v10, 1 }
  0x34   : > { %v653_v33 = vor.u32 %v652_v24, %v649_v19  ;;  %711 = vrot.lane.b32.xlu1 %v702_v31, %s1184_s26  ;;  %664 = vrot.lane.b32.xlu0 %v636_v62, %s1185_s3  ;;  %v658_v38 = vrot.slane %v656_v2, 4  ;;  %v493_v40 = vsel %vm485_vm14, 65537, %v1183_v1  ;;  %v549_v41 = vrot.slane %v1375_v4, 4  ;;  %vm338_vm1 = vmpackc.low %vm1437_vm15, %vm1437_vm15 }
  0x35   : > { %v661_v39 = vrot.slane %v659_v29, 5  ;;  %v551_v10 = vshrl.u32 %v492_v34, 16  ;;  %v554_v42 = vshll.u32 %v492_v34, 16  ;;  %v560_v43 = vshrl.u32 %v493_v40, 16 }
  0x36   : > { %v654_v3 = vsel %vm353_vm12, %v644_v28, %v653_v33  ;;  %v563_v45 = vshll.u32 %v493_v40, 16  ;;  %v345_v4 = vsel %vm337_vm11, 65537, %v1183_v1  ;;  %v1459_v46 = vsel %vm338_vm1, 65537, %v1183_v1 }
  0x37   : > { %v662_v44 = vor.u32 %v661_v39, %v658_v38  ;;  %v553_v47 = vrot.slane %v551_v10, 7  ;;  %v562_v50 = vrot.slane %v560_v43, 7  ;;  %v357_v51 = vshll.u32 %v345_v4, 16 }
  0x38   : > { %v360_v52 = vshrl.u32 %v345_v4, 16  ;;  %vm354_vm3 = vsmask.f32 7440  ;;  %668 = vrot.lane.b32.xlu1 %v654_v3, %s1185_s3  ;;  %v645_v55 = vsel %vm353_vm12, %v636_v62, %v644_v28  ;;  %v366_v56 = vshll.u32 %v1459_v46, 16 }
  0x39   : > { %672 = vrot.lane.b32.xlu0 %v662_v44, %s1185_s3  ;;  %v663_v20 = vsel %vm353_vm12, %v653_v33, %v662_v44  ;;  %v556_v58 = vor.u32 %v554_v42, %v553_v47  ;;  %v558_v61 = vrot.slane %v553_v47, 4  ;;  %v565_v63 = vor.u32 %v563_v45, %v562_v50  ;;  %vm1489_vm8 = vmor %vm353_vm12, %vm354_vm3 }
  0x3a   : > { %v567_v0 = vrot.slane %v562_v50, 4  ;;  %v359_v13 = vrot.slane %v357_v51, 5  ;;  %v362_v14 = vrot.slane %v360_v52, 4  ;;  %v1469_v19 = vrot.slane %v366_v56, 5 }
  0x3b   : > { %v370_v21 = vshrl.u32 %v1459_v46, 16  ;;  %v557_v62 = vsel %vm1309_vm7, %v549_v41, %v556_v58  ;;  %v566_v24 = vsel %vm1309_vm7, %v558_v61, %v565_v63  ;;  %vm1478_vm5 = vcmp.ge.s32.totalorder %v233_v15, 1 }
  0x3c   : > { %vm576_vm4 = vcmp.ne.s16.totalorder %v567_v0, 0  ;;  %670 = vrot.lane.b32.xlu1 %v663_v20, %s1185_s3  ;;  %vm574_vm6 = vcmp.ne.s16.totalorder %v557_v62, 0  ;;  %vm575_vm0 = vcmp.ne.s16.totalorder %v566_v24, 0  ;;  %v363_v2 = vor.u32 %v362_v14, %v359_v13  ;;  %vm340_vm7 = vmpackc.low %vm1478_vm5, %vm1478_vm5 }
  0x3d   : > { %666 = vrot.lane.b32.xlu0 %v645_v55, %s1185_s3  ;;  %v585_v28 = vsel %vm576_vm4, %v453_v57, 0  ;;  %v583_v15 = vsel %vm574_vm6, %v1395_v48, 0  ;;  %v584_v32 = vsel %vm575_vm0, %v1399_v53, 0  ;;  %vm435_vm9 = vcmp.ne.s16.totalorder %v359_v13, 0 }
  0x3e   : > { %v1006_v29 = vcombine.low %v585_v28, %v585_v28  ;;  %v1005_v31 = vcombine.low %v583_v15, %v584_v32  ;;  %v364_v33 = vrot.slane %v363_v2, 4  ;;  %v444_v34 = vsel %vm435_vm9, %v304_v25, 0 }
  0x3f   : > { %vm317_vm10 = vcmp.ge.s32.totalorder %v240_v16, 1  ;;  %vm318_vm11 = vcmp.ge.s32.totalorder %v247_v17, 1  ;;  %v348_v37 = vsel %vm340_vm7, 65537, %v1183_v1  ;;  %vm1502_vm13 = vcmp.ge.s32.totalorder %v261_v49, 1 }
  0x40   : > { %v705_v35 = vrot.slane %v1006_v29, 5  ;;  %vm341_vm12 = vmpackc.low %vm317_vm10, %vm317_vm10  ;;  %v703_v39 = vrot.slane %v1005_v31, 5  ;;  %v369_v40 = vsel %vm1489_vm8, %v364_v33, %v1469_v19  ;;  %v386_v16 = vshll.u32 %v348_v37, 16 }
  0x41   : > { %vm342_vm14 = vmpackc.low %vm318_vm11, %vm318_vm11  ;;  %v349_v7 = vsel %vm341_vm12, 65537, %v1183_v1  ;;  %vm436_vm15 = vcmp.ne.s16.totalorder %v369_v40, 0  ;;  %v390_v17 = vshrl.u32 %v348_v37, 16  ;;  %vm315_vm4 = vcmp.ge.s32.totalorder %v226_v11, 1 }
  0x42   : > { %v350_v8 = vsel %vm342_vm14, 65537, %v1183_v1  ;;  %v396_v41 = vshll.u32 %v349_v7, 16  ;;  %vm344_vm1 = vmpackc.low %vm1502_vm13, %vm1502_vm13  ;;  %v706_v12 = vsel %vm697_vm2, %v703_v39, %v705_v35  ;;  %v704_v49 = vsel %vm697_vm2, %v1409_v23, %v703_v39 }
  0x43   : > { %v445_v3 = vsel %vm436_vm15, %v1352_v59, 0  ;;  %v1518_v10 = vrot.slane %v386_v16, 5  ;;  %715 = vrot.lane.b32.xlu1 %v706_v12, %s1184_s26  ;;  %713 = vrot.lane.b32.xlu0 %v704_v49, %s1184_s26  ;;  %v392_v43 = vrot.slane %v390_v17, 4  ;;  %v400_v45 = vshrl.u32 %v349_v7, 16  ;;  %vm339_vm5 = vmpackc.low %vm315_vm4, %vm315_vm4  ;;  %s1127_s26 = scalar_lea.vmem %s1126_s25, 2048 }
  0x44   : > { %v1522_v42 = vcombine.low %v444_v34, %v445_v3  ;;  %v398_v44 = vrot.slane %v396_v41, 5  ;;  %v406_v4 = vshll.u32 %v350_v8, 16  ;;  %v410_v47 = vshrl.u32 %v350_v8, 16  ;;  %p1129_p1 = scmp.lt.s32.totalorder %s1127_s26, %s1121_s23 }
  0x45   : > { %v352_v50 = vsel %vm344_vm1, 65537, %v1183_v1  ;;  %vm319_vm2 = vcmp.ge.s32.totalorder %v254_v18, 1  ;;  %v393_v59 = vor.u32 %v392_v43, %v1518_v10  ;;  %v402_v23 = vrot.slane %v400_v45, 4 }
  0x46   : > { %v426_v51 = vshll.u32 %v352_v50, 16  ;;  %v430_v52 = vshrl.u32 %v352_v50, 16  ;;  %vm343_vm3 = vmpackc.low %vm319_vm2, %vm319_vm2  ;;  %v408_v54 = vrot.slane %v406_v4, 5  ;;  %v412_v55 = vrot.slane %v410_v47, 4  ;;  %p1130_p2 = por %p1129_p1, %p1128_p0 }
  0x47   : > { %v351_v20 = vsel %vm343_vm3, 65537, %v1183_v1  ;;  %v394_v56 = vrot.slane %v393_v59, 4  ;;  %v403_v57 = vor.u32 %v402_v23, %v398_v44  ;;  %v347_v0 = vsel %vm339_vm5, 65537, %v1183_v1 }
  0x48   : > { %v428_v58 = vrot.slane %v426_v51, 5  ;;  %v432_v61 = vrot.slane %v430_v52, 4  ;;  %v413_v9 = vor.u32 %v412_v55, %v408_v54  ;;  %v416_v18 = vshll.u32 %v351_v20, 16  ;;  %p1131_p3 = pnand %p1130_p2, %p1124_p13 }
  0x49   : > { %v420_v63 = vshrl.u32 %v351_v20, 16  ;;  %v399_v13 = vsel %vm1489_vm8, %v394_v56, %v398_v44  ;;  %v404_v14 = vrot.slane %v403_v57, 4  ;;  %v372_v24 = vrot.slane %v370_v21, 4 }
  0x4a   : > { %v433_v62 = vor.u32 %v432_v61, %v428_v58  ;;  %vm1536_vm6 = vcmp.ne.s16.totalorder %v399_v13, 0  ;;  %v414_v11 = vrot.slane %v413_v9, 4  ;;  %v418_v25 = vrot.slane %v416_v18, 5 }
  0x4b   : > { %v422_v26 = vrot.slane %v420_v63, 4  ;;  %v409_v28 = vsel %vm1489_vm8, %v404_v14, %v408_v54  ;;  %v448_v1 = vsel %vm1536_vm6, %v1371_v27, 0  ;;  %v373_v15 = vor.u32 %v372_v24, %v1469_v19 }
  0x4c   : > { %v434_v2 = vrot.slane %v433_v62, 4  ;;  %vm440_vm0 = vcmp.ne.s16.totalorder %v409_v28, 0  ;;  %v419_v46 = vsel %vm1489_vm8, %v414_v11, %v418_v25  ;;  %v376_v32 = vshll.u32 %v347_v0, 16 }
  0x4d   : > { %v423_v21 = vor.u32 %v422_v26, %v418_v25  ;;  %v449_v29 = vsel %vm440_vm0, %v1379_v30, 0  ;;  %vm441_vm9 = vcmp.ne.s16.totalorder %v419_v46, 0  ;;  %v374_v31 = vrot.slane %v373_v15, 4 }
  0x4e   : > { %vm443_vm7 = vcmp.ne.s16.totalorder %v434_v2, 0  ;;  %v995_v33 = vcombine.low %v448_v1, %v449_v29  ;;  %v450_v27 = vsel %vm441_vm9, %v1382_v36, 0  ;;  %v378_v37 = vrot.slane %v376_v32, 5 }
  0x4f   : > { %v452_v34 = vsel %vm443_vm7, %v1399_v53, 0  ;;  %v424_v35 = vrot.slane %v423_v21, 4  ;;  %v380_v38 = vshrl.u32 %v347_v0, 16  ;;  %vm717_vm13 = vcmask 130048  }
  0x50   : > { %v379_v39 = vsel %vm1489_vm8, %v374_v31, %v378_v37  ;;  %vm733_vm14 = vcmask 261120   ;;  %v997_v54 = vcombine.low %v452_v34, %v452_v34  ;;  %vm808_vm15 = vcmask 392192  }
  0x51   : > { %v429_v19 = vsel %vm1489_vm8, %v424_v35, %v428_v58  ;;  %v382_v40 = vrot.slane %v380_v38, 4  ;;  %vm437_vm11 = vcmp.ne.s16.totalorder %v379_v39, 0 }
  0x52   : > { %vm442_vm10 = vcmp.ne.s16.totalorder %v429_v19, 0  ;;  %v446_v53 = vsel %vm437_vm11, %v1354_v60, 0 }
  0x53   : > { %v451_v30 = vsel %vm442_vm10, %v1395_v48, 0  ;;  %v383_v16 = vor.u32 %v382_v40, %v378_v37 }
  0x54   : > { %v996_v7 = vcombine.low %v450_v27, %v451_v30 }
  0x55   : > { %v384_v8 = vrot.slane %v383_v16, 4 }
  0x57   : > { %v389_v36 = vsel %vm1489_vm8, %v384_v8, %v1518_v10  ;;  %vm750_vm8 = vsmask.f32 4352 }
  0x58   : > { %vm438_vm12 = vcmp.ne.s16.totalorder %v389_v36, 0 }
  0x59   : > { %v447_v17 = vsel %vm438_vm12, %v1368_v22, 0 }
  0x5a   : > { %v994_v41 = vcombine.low %v446_v53, %v447_v17 }
  0x9d   : > { %v708_v12 = vpop.permute.xlu1 %707 }
  0xa2   : > { %v710_v49 = vpop.permute.xlu0 %709 }
  0xa6   : > { %v712_v3 = vpop.permute.xlu1 %711  ;;  %v665_v43 = vpop.permute.xlu0 %664 }
  0xa7   : > { %v720_v48 = vsel %vm717_vm13, %v1522_v42, %v665_v43 }
  0xa8   : > { %v735_v45 = vsel %vm733_vm14, %v720_v48, %v708_v12 }
  0xa9   : > { %v751_v4 = vshrl.u32 %v735_v45, 16  ;;  %v754_v22 = vshll.u32 %v735_v45, 16 }
  0xaa   : > { %v669_v44 = vpop.permute.xlu1 %668 }
  0xab   : > { %v673_v60 = vpop.permute.xlu0 %672  ;;  %v726_v6 = vsel %vm717_vm13, %v995_v33, %v669_v44  ;;  %v753_v55 = vrot.slane %v751_v4, 3  ;;  %v756_v56 = vrot.slane %v754_v22, 4 }
  0xac   : > { %v739_v10 = vsel %vm733_vm14, %v726_v6, %v712_v3  ;;  %v732_v18 = vsel %vm717_vm13, %v997_v54, %v673_v60 }
  0xad   : > { %v766_v47 = vshrl.u32 %v739_v10, 16  ;;  %v769_v50 = vshll.u32 %v739_v10, 16  ;;  %v757_v11 = vor.u32 %v756_v56, %v753_v55 }
  0xae   : > { %v671_v23 = vpop.permute.xlu1 %670 }
  0xaf   : > { %v667_v59 = vpop.permute.xlu0 %666  ;;  %v768_v57 = vrot.slane %v766_v47, 3  ;;  %v771_v58 = vrot.slane %v769_v50, 4  ;;  %v729_v63 = vsel %vm717_vm13, %v996_v7, %v671_v23 }
  0xb0   : > { %v723_v51 = vsel %vm717_vm13, %v994_v41, %v667_v59 }
  0xb1   : > { %v737_v52 = vsel %vm733_vm14, %v723_v51, %v710_v49  ;;  %v772_v62 = vor.u32 %v771_v58, %v768_v57 }
  0xb2   : > { %v758_v42 = vshrl.u32 %v737_v52, 16  ;;  %v761_v20 = vshll.u32 %v737_v52, 16 }
  0xb4   : > { %v760_v61 = vrot.slane %v758_v42, 3  ;;  %v763_v9 = vrot.slane %v761_v20, 4 }
  0xb5   : > { %v716_v0 = vpop.permute.xlu1 %715  ;;  %v714_v13 = vpop.permute.xlu0 %713 }
  0xb6   : > { %v764_v14 = vor.u32 %v763_v9, %v760_v61  ;;  %v743_v24 = vsel %vm733_vm14, %v732_v18, %v716_v0  ;;  %v741_v5 = vsel %vm733_vm14, %v729_v63, %v714_v13 }
  0xb7   : > { %v782_v25 = vshrl.u32 %v743_v24, 16  ;;  %v785_v26 = vshll.u32 %v743_v24, 16  ;;  %v774_v28 = vshrl.u32 %v741_v5, 16  ;;  %v777_v1 = vshll.u32 %v741_v5, 16 }
  0xb8   : > { %v765_v2 = vsel %vm750_vm8, %v757_v11, %v764_v14  ;;  %v773_v15 = vsel %vm750_vm8, %v764_v14, %v772_v62 }
  0xb9   : > { %v784_v46 = vrot.slane %v782_v25, 3  ;;  %v787_v21 = vrot.slane %v785_v26, 4  ;;  %v776_v32 = vrot.slane %v774_v28, 3  ;;  %v779_v29 = vrot.slane %v777_v1, 4  ;;  %1041 = vmatprep.mubr.msk.bf16.mxu0 %vm808_vm15, %v765_v2 }
  0xba   : > { %1042 = vmatmul.mubr.msk.bf16.vlgmr.msra.gmra.mxu0 %vm808_vm15, %v773_v15 }
  0xbb   : > { %v788_v31 = vor.u32 %v787_v21, %v784_v46  ;;  %v780_v33 = vor.u32 %v779_v29, %v776_v32 }
  0xbd   : > { %v781_v34 = vsel %vm750_vm8, %v772_v62, %v780_v33  ;;  %v789_v35 = vsel %vm750_vm8, %v780_v33, %v788_v31 }
  0xbe   : > { %1045 = vmatprep.mubr.msk.bf16.mxu1 %vm808_vm15, %v781_v34 }
  0xbf   : > { %1046 = vmatmul.mubr.msk.bf16.vlgmr.msra.gmra.mxu1 %vm808_vm15, %v789_v35 }
 0x17a   : > { %v1043_v27 = vpop.f32.mrf.mxu0 }
 0x17b   : > { %1105 = vtanh.f32 %v1043_v27 }
 0x17c   : > { %v855_v37 = vpop.f32.mrf.mxu0 }
 0x17d   : > { %1107 = vtanh.f32 %v855_v37 }
 0x17e   : > { %v1044_v38 = vpop.f32.mrf.mxu0 }
 0x17f   : > { %v1047_v19 = vpop.f32.mrf.mxu1  ;;  %1109 = vtanh.f32 %v1044_v38 }
 0x180   : > { %1111 = vtanh.f32 %v1047_v19  ;;  %v858_v39 = vpop.f32.mrf.mxu0 }
 0x181   : > { %v871_v40 = vpop.f32.mrf.mxu1  ;;  %1113 = vtanh.f32 %v858_v39 }
 0x182   : > { %1115 = vtanh.f32 %v871_v40 }
 0x183   : > { %v1048_v30 = vpop.f32.mrf.mxu1 }
 0x184   : > { %1117 = vtanh.f32 %v1048_v30 }
 0x185   : > { %v874_v7 = vpop.f32.mrf.mxu1 }
 0x186   : > { %1119 = vtanh.f32 %v874_v7 }
 0x188   : > { %v1106_v16 = vpop.eup %1105 }
 0x189   : > { %896 = vst [vmem:[%s137_s8 + $0x10] sm:$0xff] %v1106_v16 }
 0x18a   : > { %v1108_v53 = vpop.eup %1107 }
 0x18b   : > { %894 = vst [vmem:[%s137_s8] sm:$0xff] %v1108_v53 }
 0x18c   : > { %v1110_v8 = vpop.eup %1109 }
 0x18d   : > { %v1112_v36 = vpop.eup %1111  ;;  %897 = vst [vmem:[%s137_s8 + $0x18] sm:$0xff] %v1110_v8 }
 0x18e   : > { %v1114_v17 = vpop.eup %1113  ;;  %900 = vst [vmem:[%s137_s8 + $0x30] sm:$0xff] %v1112_v36 }
 0x18f   : > { %v1116_v41 = vpop.eup %1115  ;;  %895 = vst [vmem:[%s137_s8 + $0x8] sm:$0xff] %v1114_v17 }
 0x190   : > { %898 = vst [vmem:[%s137_s8 + $0x20] sm:$0xff] %v1116_v41 }
 0x191   : > { %v1118_v12 = vpop.eup %1117 }
 0x192   : > { %901 = vst [vmem:[%s137_s8 + $0x38] sm:$0xff] %v1118_v12 }
 0x193   : > { %v1120_v49 = vpop.eup %1119 }
 0x194   : > { %899 = vst [vmem:[%s137_s8 + $0x28] sm:$0xff] %v1120_v49 }
 0x195   : > { %1134 = shalt.err (!%p1131_p3)
}
 0x196   : > { %s1135_s27 = scalar_lea.hbm %s1587_s22, 1024  ;;  %s1139_s30 = scalar_lea.hbm %s1635_s2, 2048 }
 0x197   : > { %p1136_p4 = scmp.ne.s32.totalorder %s1587_s22, %s1135_s27  ;;  %p1140_p9 = scmp.lt.s32.totalorder %s1587_s22, %s1635_s2 }
 0x198   : > { %p1141_p10 = scmp.lt.s32.totalorder %s1139_s30, %s1135_s27 }
 0x199   : > { %p1137_p7 = pnand %p1136_p4, %p1242_p5 }
 0x19a   : > { %p1142_p11 = por %p1141_p10, %p1140_p9 }
 0x19b   : > { %p1138_p8 = pneg %p1137_p7 }
 0x19d   : > { %p1143_p12 = pnand %p1142_p11, %p1138_p8 }
 0x19f   : > { %1146 = shalt.err (!%p1143_p12)
}
 0x1a0   : > { %s1187_s5 = smov 128   ;;  %s1188_s6 = smov 8  }
 0x1a1   : > { %1055 = dma.vmem_to_hbm [thread:$0]  (%p1242_p5), %s1589_s16, 1024, %s1587_s22, %s1593_s13, %s1187_s5, %s1187_s5, %s1188_s6  }
 0x1a2 PF: > { %p1061_p13 = scmp.ge.s32.totalorder %s1181_s12, 2  ;;  %s931_s7 = sand.u32 1, %s1169_s9  }
 0x1a3   : > { %s932_s8 = scalar_lea.sflag [#allocation4], %s931_s7 }
 0x1a4   : > { %p1058_p0 = pnand %p1061_p13, %p1246_p6 }
 0x1a6   : > { %p1059_p1 = pneg %p1058_p0 }
 0x1a8   : > { %1164 = dma.done.wait (%p1059_p1), %s932_s8, 1024  }
 0x1a9   : > { %1166 = vsyncadd (%p1059_p1), %s932_s8, 4294966272  ;;  %p12_p2 = scmp.ge.s32.totalorder %s1229_s15, 4   ;;  %s1662_s9 = smov %s1173_s10 }
 0x1aa   : > { %s1663_s10 = smov %s1177_s11  ;;  %s1664_s11 = smov %s1240_s18 }
 0x1ab   : > { %s1665_s12 = smov %s1229_s15  ;;  %14 = sbr.rel (!%p12_p2) target bundleno = 3 (0x3), region = 63 }
 0x1b0   :  { %937 = vsyncpa [#allocation4], 1 }
 0x1b1   :  { %939 = vsyncpa [#allocation4 + $0x1], 1 }

</bundles_post_ra>
